<compile_context>
chip_gen: v6e
topology: v6e:2x2x1
jax: 0.10.0
libtpu: 0.0.40
codegen_flags: <defaults>
</compile_context>

<pallas_src>
import functools

import jax
import jax.numpy as jnp
from jax.experimental import pallas as pl
from jax.experimental.pallas import tpu as pltpu


def _round_up(x, m):
    return ((x + m - 1) // m) * m


def _pad2(x, rows, cols):
    return jnp.pad(x, ((0, rows - x.shape[0]), (0, cols - x.shape[1])))


def _vmem_limit_bytes():
    """Per-generation scoped-VMEM budget (~85% of capacity, capped at 110 MiB)."""
    cap = 64 * 1024 * 1024  # conservative fallback (v7x per-TC size)
    try:
        info = pltpu.get_tpu_info()
        cap = int(getattr(info, "vmem_capacity_bytes", cap) or cap)
    except Exception:
        pass
    return int(min(cap * 0.85, 110 * 1024 * 1024))


def _pick_tile_m(np_rough, fp, hp, vmem_limit):
    """Largest 128-multiple row tile (<=512) whose working set fits the VMEM budget."""
    f = max(fp, hp)
    # Residents (x2 safety for potential double-buffering of constant-index specs):
    # node features + both projection weights + bias.
    resident = 2 * (np_rough * f * 2 + 2 * f * hp * 2 + hp * 4)
    headroom = 8 << 20  # mosaic internal scratch, misc temps
    avail = vmem_limit - resident - headroom
    # Per destination row: int8 A stripe (double-buffered) + in-kernel bf16 upcast
    # + f32 neigh/out temps + bf16 x_tile copy + double-buffered output + dinv.
    per_row = 2 * np_rough + 2 * np_rough + f * 4 + f * 2 + hp * 4 + 2 * hp * 4 + 8
    tile = avail // per_row if per_row > 0 else 128
    tile = int(max(128, min(512, (tile // 128) * 128)))
    return min(tile, np_rough)


def _sage_layer_kernel(a_ref, dinv_ref, x_ref, ws_ref, wn_ref, b_ref, o_ref,
                       *, tile_m, apply_relu):
    """One SAGEConv('mean') layer for a stripe of `tile_m` destination rows.

    a_ref    : (tile_m, Np) int8   binary adjacency stripe (exact 0/1), streamed
    dinv_ref : (tile_m, 1)  f32    per-destination-row 1/max(in_deg, 1)
    x_ref    : (Np, Fp)     bf16   all node features, VMEM-resident
    ws_ref   : (Fp, Hp)     bf16   self projection weight
    wn_ref   : (Fp, Hp)     bf16   neighbor projection weight
    b_ref    : (1, Hp)      f32    bias
    o_ref    : (tile_m, Hp)        output stripe
    """
    i = pl.program_id(0)
    row0 = pl.multiple_of(i * tile_m, tile_m)

    # 0/1 values are exact in bf16; HBM only ever sees int8 for A.
    a = a_ref[...].astype(jnp.bfloat16)                   # (TM, Np)
    x_all = x_ref[...]                                    # (Np, Fp), resident
    x_tile = x_ref[pl.ds(row0, tile_m), :]                # (TM, Fp)

    # Mean aggregation on the MXU: f32 accumulation, exact f32 1/deg scaling.
    neigh = jnp.dot(a, x_all, preferred_element_type=jnp.float32)
    neigh = neigh * dinv_ref[...]                          # (TM, Fp) f32

    out = (jnp.dot(x_tile, ws_ref[...], preferred_element_type=jnp.float32)
           + jnp.dot(neigh.astype(jnp.bfloat16), wn_ref[...],
                     preferred_element_type=jnp.float32)
           + b_ref[...])
    if apply_relu:
        out = jnp.maximum(out, 0.0)
    o_ref[...] = out.astype(o_ref.dtype)


def _sage_layer(a_i8, dinv, x_p, w_self, w_neigh, b, *, tile_m, out_dtype,
                apply_relu, vmem_limit):
    np_, fp = x_p.shape
    hp = w_self.shape[1]
    nt = np_ // tile_m

    flops = 2 * np_ * np_ * fp + 2 * (2 * np_ * fp * hp)
    bytes_accessed = (np_ * np_ * 1                      # A (int8)
                      + np_ * fp * 2 + 2 * fp * hp * 2   # features + weights (bf16)
                      + np_ * 4 + hp * 4                 # dinv + bias (f32)
                      + np_ * hp * jnp.dtype(out_dtype).itemsize)

    kernel = functools.partial(_sage_layer_kernel, tile_m=tile_m,
                               apply_relu=apply_relu)
    return pl.pallas_call(
        kernel,
        out_shape=jax.ShapeDtypeStruct((np_, hp), out_dtype),
        grid=(nt,),
        in_specs=[
            pl.BlockSpec((tile_m, np_), lambda i: (i, 0)),  # A row stripe (streamed)
            pl.BlockSpec((tile_m, 1), lambda i: (i, 0)),    # 1/deg row stripe
            pl.BlockSpec((np_, fp), lambda i: (0, 0)),      # X / H, VMEM-resident
            pl.BlockSpec((fp, hp), lambda i: (0, 0)),       # W_self, resident
            pl.BlockSpec((fp, hp), lambda i: (0, 0)),       # W_neigh, resident
            pl.BlockSpec((1, hp), lambda i: (0, 0)),        # bias
        ],
        out_specs=pl.BlockSpec((tile_m, hp), lambda i: (i, 0)),
        compiler_params=pltpu.CompilerParams(
            dimension_semantics=("parallel",),   # row tiles independent -> megacore-friendly
            vmem_limit_bytes=vmem_limit,
        ),
        cost_estimate=pl.CostEstimate(
            flops=flops, transcendentals=0, bytes_accessed=bytes_accessed),
    )(a_i8, dinv, x_p, w_self, w_neigh, b)


def graphsage_forward(adj, x, params, *, tile_m=None):
    """Two-layer GraphSAGE ('mean') forward.

    adj: (N, N) binary adjacency; adj[i, j] = 1 iff there is an edge j -> i
         (j is an in-neighbor of destination i). Any 0/1 float/int/bool dtype.
    x:   (N, in_feats) node features (float32).
    Returns (N, h_feats) float32.
    """
    n, in_f = x.shape
    h_f = params["w_self1"].shape[1]

    vmem_limit = _vmem_limit_bytes()
    fp = _round_up(in_f, 128)
    hp = _round_up(h_f, 128)
    np_rough = _round_up(n, 128)
    if tile_m is None:
        tile_m = _pick_tile_m(np_rough, fp, hp, vmem_limit)
    np_ = _round_up(n, tile_m)
    assert np_ % tile_m == 0

    bf = jnp.bfloat16
    adj_f = adj.astype(jnp.float32)
    deg = adj_f.sum(axis=1, keepdims=True)                       # in-degree per dest row
    dinv = 1.0 / jnp.maximum(deg, 1.0)                           # DGL 'mean': 0-deg rows -> 0

    a_i8 = _pad2(adj_f.astype(jnp.int8), np_, np_)               # exact 0/1, half the bytes
    dinv_p = _pad2(dinv, np_, 1).astype(jnp.float32)
    x_p = _pad2(x, np_, fp).astype(bf)
    ws1 = _pad2(params["w_self1"], fp, hp).astype(bf)
    wn1 = _pad2(params["w_neigh1"], fp, hp).astype(bf)
    ws2 = _pad2(params["w_self2"], hp, hp).astype(bf)
    wn2 = _pad2(params["w_neigh2"], hp, hp).astype(bf)
    b1 = _pad2(params["b1"], 1, hp).astype(jnp.float32)
    b2 = _pad2(params["b2"], 1, hp).astype(jnp.float32)

    # Layer 1 (+ReLU); intermediate H kept in bf16 to halve its HBM round-trip.
    h = _sage_layer(a_i8, dinv_p, x_p, ws1, wn1, b1, tile_m=tile_m,
                    out_dtype=jnp.bfloat16, apply_relu=True, vmem_limit=vmem_limit)
    # Layer 2; f32 output matching the PyTorch module.
    out = _sage_layer(a_i8, dinv_p, h, ws2, wn2, b2, tile_m=tile_m,
                      out_dtype=jnp.float32, apply_relu=False, vmem_limit=vmem_limit)
    return out[:n, :h_f]


def init_graphsage_params(key, in_feats, h_feats):
    """Deterministic synthetic params mirroring DGL SAGEConv('mean') layout:
    fc_self / fc_neigh weights stored pre-transposed as (in, out); bias (1, out)."""
    ks = jax.random.split(key, 4)

    def lin(k, fan_in, fan_out):
        bound = 1.0 / jnp.sqrt(jnp.asarray(fan_in, jnp.float32))
        return jax.random.uniform(k, (fan_in, fan_out), jnp.float32, -bound, bound)

    return {
        "w_self1": lin(ks[0], in_feats, h_feats),
        "w_neigh1": lin(ks[1], in_feats, h_feats),
        "b1": jnp.zeros((1, h_feats), jnp.float32),
        "w_self2": lin(ks[2], h_feats, h_feats),
        "w_neigh2": lin(ks[3], h_feats, h_feats),
        "b2": jnp.zeros((1, h_feats), jnp.float32),
    }


if __name__ == "__main__":
    N = 200          # number of graph nodes (pads to 256 -> single row tile)
    IN_FEATS = 32    # input feature dim (pads to 128 lanes)
    H_FEATS = 32     # hidden feature dim (pads to 128 lanes)

    key = jax.random.PRNGKey(0)
    k_adj, k_feat, k_par = jax.random.split(key, 3)

    # Synthetic directed graph, no self loops; adj[i, j] = 1 iff edge j -> i.
    adj = (jax.random.uniform(k_adj, (N, N)) < 0.3).astype(jnp.float32)
    adj = adj * (1.0 - jnp.eye(N, dtype=jnp.float32))

    x = jax.random.normal(k_feat, (N, IN_FEATS), jnp.float32)
    params = init_graphsage_params(k_par, IN_FEATS, H_FEATS)

    out = graphsage_forward(adj, x, params)
    jax.block_until_ready(out)
    assert out.shape == (N, H_FEATS)

    # Reference 1: same bf16-operand / f32-accumulation / f32-deg-scale semantics.
    def ref_bf16(a, xx, p):
        bf, f32 = jnp.bfloat16, jnp.float32
        deg = a.sum(axis=1, keepdims=True)
        dinv = 1.0 / jnp.maximum(deg, 1.0)
        a_b = a.astype(bf)

        def layer(feat, ws, wn, b, relu):
            f_b = feat.astype(bf)
            nb = (jnp.dot(a_b, f_b, preferred_element_type=f32) * dinv).astype(bf)
            o = (jnp.dot(f_b, ws.astype(bf), preferred_element_type=f32)
                 + jnp.dot(nb, wn.astype(bf), preferred_element_type=f32) + b)
            return jnp.maximum(o, 0.0) if relu else o

        hh = layer(xx, p["w_self1"], p["w_neigh1"], p["b1"], True)
        return layer(hh, p["w_self2"], p["w_neigh2"], p["b2"], False)

    # Reference 2: full-f32 math (loose tolerance covers bf16 operand rounding).
    def ref_f32(a, xx, p):
        a_norm = a / jnp.maximum(a.sum(axis=1, keepdims=True), 1.0)
        hh = xx @ p["w_self1"] + (a_norm @ xx) @ p["w_neigh1"] + p["b1"]
        hh = jnp.maximum(hh, 0.0)
        return hh @ p["w_self2"] + (a_norm @ hh) @ p["w_neigh2"] + p["b2"]

    assert jnp.allclose(out, ref_bf16(adj, x, params), atol=2e-3, rtol=2e-3)
    assert jnp.allclose(out, ref_f32(adj, x, params), atol=5e-2, rtol=5e-2)

    print("KERNEL_OK")
</pallas_src>

<mosaic_0001>
module attributes {stable_mosaic.version = 11 : i64} {
  func.func @_sage_layer_kernel(%arg0: i32, %arg1: memref<256x256xi8, #tpu.memory_space<vmem>>, %arg2: memref<256x1xf32, #tpu.memory_space<vmem>>, %arg3: memref<256x128xbf16, #tpu.memory_space<vmem>>, %arg4: memref<128x128xbf16, #tpu.memory_space<vmem>>, %arg5: memref<128x128xbf16, #tpu.memory_space<vmem>>, %arg6: memref<1x128xf32, #tpu.memory_space<vmem>>, %arg7: memref<256x128xbf16, #tpu.memory_space<vmem>>) attributes {dimension_semantics = [#tpu.dimension_semantics<parallel>], iteration_bounds = array<i64: 1>, scalar_prefetch = 0 : i64, scratch_operands = 0 : i64, tpu.core_type = #tpu.core_type<tc>, window_params = [{transform_indices = @transform_0, window_bounds = array<i64: 256, 256>}, {transform_indices = @transform_1, window_bounds = array<i64: 256, 1>}, {pipeline_mode = #tpu.pipeline_mode<synchronous>, transform_indices = @transform_2, window_bounds = array<i64: 256, 128>}, {pipeline_mode = #tpu.pipeline_mode<synchronous>, transform_indices = @transform_3, window_bounds = array<i64: 128, 128>}, {pipeline_mode = #tpu.pipeline_mode<synchronous>, transform_indices = @transform_4, window_bounds = array<i64: 128, 128>}, {pipeline_mode = #tpu.pipeline_mode<synchronous>, transform_indices = @transform_5, window_bounds = array<i64: 1, 128>}, {transform_indices = @transform_6, window_bounds = array<i64: 256, 128>}]} {
    %c256_i32 = arith.constant 256 : i32
    %0 = arith.muli %arg0, %c256_i32 : i32
    %1 = tpu.assume_multiple %0, 256 : i32
    %c0 = arith.constant 0 : index
    %c0_0 = arith.constant 0 : index
    %2 = vector.load %arg1[%c0, %c0_0] : memref<256x256xi8, #tpu.memory_space<vmem>>, vector<256x256xi8>
    %3 = arith.sitofp %2 : vector<256x256xi8> to vector<256x256xbf16>
    %c0_1 = arith.constant 0 : index
    %c0_2 = arith.constant 0 : index
    %4 = vector.load %arg3[%c0_1, %c0_2] : memref<256x128xbf16, #tpu.memory_space<vmem>>, vector<256x128xbf16>
    %5 = arith.index_cast %1 : i32 to index
    %c0_3 = arith.constant 0 : index
    %6 = vector.load %arg3[%5, %c0_3] : memref<256x128xbf16, #tpu.memory_space<vmem>>, vector<256x128xbf16>
    %cst = arith.constant dense<0.000000e+00> : vector<256x128xf32>
    %7 = tpu.matmul %3, %4, %cst {dimension_numbers = #tpu.dot_dimension_numbers<[1], [0], [0], [1], [0, 0, 1, 1], [], []>} : vector<256x256xbf16>, vector<256x128xbf16>, vector<256x128xf32> -> vector<256x128xf32>
    %c0_4 = arith.constant 0 : index
    %c0_5 = arith.constant 0 : index
    %8 = vector.load %arg2[%c0_4, %c0_5] : memref<256x1xf32, #tpu.memory_space<vmem>>, vector<256x1xf32>
    %9 = vector.broadcast %8 : vector<256x1xf32> to vector<256x128xf32>
    %10 = arith.mulf %7, %9 : vector<256x128xf32>
    %c0_6 = arith.constant 0 : index
    %c0_7 = arith.constant 0 : index
    %11 = vector.load %arg4[%c0_6, %c0_7] : memref<128x128xbf16, #tpu.memory_space<vmem>>, vector<128x128xbf16>
    %cst_8 = arith.constant dense<0.000000e+00> : vector<256x128xf32>
    %12 = tpu.matmul %6, %11, %cst_8 {dimension_numbers = #tpu.dot_dimension_numbers<[1], [0], [0], [1], [0, 0, 1, 1], [], []>} : vector<256x128xbf16>, vector<128x128xbf16>, vector<256x128xf32> -> vector<256x128xf32>
    %13 = arith.truncf %10 : vector<256x128xf32> to vector<256x128xbf16>
    %c0_9 = arith.constant 0 : index
    %c0_10 = arith.constant 0 : index
    %14 = vector.load %arg5[%c0_9, %c0_10] : memref<128x128xbf16, #tpu.memory_space<vmem>>, vector<128x128xbf16>
    %cst_11 = arith.constant dense<0.000000e+00> : vector<256x128xf32>
    %15 = tpu.matmul %13, %14, %cst_11 {dimension_numbers = #tpu.dot_dimension_numbers<[1], [0], [0], [1], [0, 0, 1, 1], [], []>} : vector<256x128xbf16>, vector<128x128xbf16>, vector<256x128xf32> -> vector<256x128xf32>
    %16 = arith.addf %12, %15 : vector<256x128xf32>
    %c0_12 = arith.constant 0 : index
    %c0_13 = arith.constant 0 : index
    %17 = vector.load %arg6[%c0_12, %c0_13] : memref<1x128xf32, #tpu.memory_space<vmem>>, vector<1x128xf32>
    %18 = vector.broadcast %17 : vector<1x128xf32> to vector<256x128xf32>
    %19 = arith.addf %16, %18 : vector<256x128xf32>
    %cst_14 = arith.constant 0.000000e+00 : f32
    %20 = vector.broadcast %cst_14 : f32 to vector<256x128xf32>
    %21 = arith.maximumf %19, %20 : vector<256x128xf32>
    %22 = arith.truncf %21 : vector<256x128xf32> to vector<256x128xbf16>
    %c0_15 = arith.constant 0 : index
    %c0_16 = arith.constant 0 : index
    %23 = vector.load %arg7[%c0_15, %c0_16] : memref<256x128xbf16, #tpu.memory_space<vmem>>, vector<256x128xbf16>
    tpu.vector_store %arg7[%c0_15, %c0_16], %22 {strides = array<i32>} : memref<256x128xbf16, #tpu.memory_space<vmem>>, vector<256x128xbf16>,
    return
  }
  func.func @transform_0(%arg0: i32) -> (i32, i32) {
    %c0_i32 = arith.constant 0 : i32
    %c0_i32_0 = arith.constant 0 : i32
    return %arg0, %c0_i32 : i32, i32
  }
  func.func @transform_1(%arg0: i32) -> (i32, i32) {
    %c0_i32 = arith.constant 0 : i32
    %c0_i32_0 = arith.constant 0 : i32
    return %arg0, %c0_i32 : i32, i32
  }
  func.func @transform_2(%arg0: i32) -> (i32, i32) {
    %c0_i32 = arith.constant 0 : i32
    %c0_i32_0 = arith.constant 0 : i32
    %c0_i32_1 = arith.constant 0 : i32
    return %c0_i32, %c0_i32_0 : i32, i32
  }
  func.func @transform_3(%arg0: i32) -> (i32, i32) {
    %c0_i32 = arith.constant 0 : i32
    %c0_i32_0 = arith.constant 0 : i32
    %c0_i32_1 = arith.constant 0 : i32
    return %c0_i32, %c0_i32_0 : i32, i32
  }
  func.func @transform_4(%arg0: i32) -> (i32, i32) {
    %c0_i32 = arith.constant 0 : i32
    %c0_i32_0 = arith.constant 0 : i32
    %c0_i32_1 = arith.constant 0 : i32
    return %c0_i32, %c0_i32_0 : i32, i32
  }
  func.func @transform_5(%arg0: i32) -> (i32, i32) {
    %c0_i32 = arith.constant 0 : i32
    %c0_i32_0 = arith.constant 0 : i32
    %c0_i32_1 = arith.constant 0 : i32
    return %c0_i32, %c0_i32_0 : i32, i32
  }
  func.func @transform_6(%arg0: i32) -> (i32, i32) {
    %c0_i32 = arith.constant 0 : i32
    %c0_i32_0 = arith.constant 0 : i32
    return %arg0, %c0_i32 : i32, i32
  }
}

</mosaic_0001>

<bundles_post_ra>
// kernel: tpu_custom_call.1
= control target key start
LH: loop header
LB: loop body
LE: loop exit
PB: predicated region body
PF: predicated region fallthrough
CT: control target
= control target key end

     0   :  { %11 = vsyncpa [#allocation3], 0  ;;  %s2455_s0 = inlined_call_operand.vmem [shape: s8[256,256], index: 0, kind: input, shape index: {}]   ;;  %s2456_s1 = inlined_call_operand.vmem [shape: f32[256,1], index: 1, kind: input, shape index: {}]   ;;  %s2457_s2 = inlined_call_operand.vmem [shape: bf16[256,128], index: 2, kind: input, shape index: {}]   ;;  %s2458_s3 = inlined_call_operand.hbm [shape: bf16[128,128], index: 3, kind: input, shape index: {}]   ;;  %s2459_s4 = inlined_call_operand.hbm [shape: bf16[128,128], index: 4, kind: input, shape index: {}]   ;;  %s2460_s5 = inlined_call_operand.vmem [shape: f32[1,128], index: 5, kind: input, shape index: {}]   ;;  %s2461_s6 = inlined_call_operand.hbm [shape: bf16[256,128], index: 6, kind: output, shape index: {}]  }
   0x1   :  { %12 = vsyncpa [#allocation6], 0 }
   0x2   :  { %13 = vsyncpa [#allocation4], 0  ;;  %s2050_s21 = smov [#allocation2]  }
   0x3   :  { %s25_s22 = sshll.u32 %s2050_s21, 4  ;;  %s26_s22 = int_to_ptr.vmem [resolvable:$true] %s25_s22 }
   0x4   :  { %s1992_s23 = scalar_lea.vmem %s26_s22, 1024  ;;  %p1997_p1 = scmp.lt.s32.totalorder %s26_s22, %s26_s22 }
   0x5   :  { %p1993_p0 = scmp.ne.s32.totalorder %s26_s22, %s1992_s23  ;;  %p1998_p2 = scmp.lt.s32.totalorder %s1992_s23, %s1992_s23 }
   0x7   :  { %p1999_p3 = por %p1998_p2, %p1997_p1 }
   0x9   :  { %p2000_p4 = pnand %p1999_p3, %p1993_p0 }
   0xb   :  { %2003 = shalt.err (!%p2000_p4)
}
   0xc   :  { %s2051_s24 = smov 64   ;;  %s2052_s25 = smov 4  }
   0xd   :  { %31 = dma.hbm_to_vmem [thread:$0]  %s2458_s3, 1024, %s26_s22, [#allocation3], %s2051_s24, %s2051_s24, %s2052_s25  }
   0xe   :  { %s2053_s28 = smov [#allocation5]  }
   0xf   :  { %s37_s29 = sshll.u32 %s2053_s28, 4  ;;  %s38_s29 = int_to_ptr.vmem [resolvable:$true] %s37_s29 }
  0x10   :  { %s2012_s30 = scalar_lea.vmem %s38_s29, 1024  ;;  %p2017_p6 = scmp.lt.s32.totalorder %s38_s29, %s38_s29 }
  0x11   :  { %p2013_p5 = scmp.ne.s32.totalorder %s38_s29, %s2012_s30  ;;  %p2018_p7 = scmp.lt.s32.totalorder %s2012_s30, %s2012_s30 }
  0x13   :  { %p2019_p8 = por %p2018_p7, %p2017_p6 }
  0x15   :  { %p2020_p9 = pnand %p2019_p8, %p2013_p5 }
  0x17   :  { %2023 = shalt.err (!%p2020_p9)
}
  0x18   :  { %43 = dma.hbm_to_vmem [thread:$0]  %s2459_s4, 1024, %s38_s29, [#allocation6], %s2051_s24, %s2051_s24, %s2052_s25  }
  0x19   :  { %2044 = dma.done.wait [#allocation3], 1024  }
  0x1a   :  { %2045 = vsyncadd [#allocation3], 4294966272 }
  0x1b   :  { %2046 = dma.done.wait [#allocation6], 1024  }
  0x1c   :  { %2047 = vsyncadd [#allocation6], 4294966272  ;;  %v2054_v0 = vmov 0   ;;  %v1936_v1 = vld [vmem:[%s2457_s2 + $0x78] sm:$0xff]   ;;  %v1938_v3 = vld [vmem:[%s2457_s2 + $0x70] sm:$0xff]  }
  0x1d   :  { %1934 = vset.pattern.permute.xlu0 %v2054_v0  ;;  %1935 = vset.pattern.permute.xlu1 %v2054_v0  ;;  %v1937_v2 = vld [vmem:[%s2457_s2 + $0x38] sm:$0xff]   ;;  %v1939_v4 = vld [vmem:[%s2457_s2 + $0x30] sm:$0xff]   ;;  %v1940_v5 = vld [vmem:[%s2457_s2 + $0x68] sm:$0xff]  }
  0x1e   :  { %1672 = vmatprep.subr.bf16.mxu0 %v1936_v1  ;;  %v1941_v6 = vld [vmem:[%s2457_s2 + $0x28] sm:$0xff]   ;;  %v1942_v7 = vld [vmem:[%s2457_s2 + $0x60] sm:$0xff]   ;;  %v1944_v9 = vld [vmem:[%s2457_s2 + $0x58] sm:$0xff]  }
  0x1f   :  { %1673 = vmatpush3.bf16.msra.mxu0 %v1937_v2  ;;  %v1943_v8 = vld [vmem:[%s2457_s2 + $0x20] sm:$0xff]   ;;  %v1945_v10 = vld [vmem:[%s2457_s2 + $0x18] sm:$0xff]   ;;  %v1946_v11 = vld [vmem:[%s2457_s2 + $0x50] sm:$0xff]  }
  0x20   :  { %1674 = vmatprep.subr.bf16.mxu0 %v1938_v3  ;;  %v55_v12 = vld [vmem:[%s2455_s0 + $0x8] sm:$0xff]  ;;  %v1947_v14 = vld [vmem:[%s2457_s2 + $0x10] sm:$0xff]   ;;  %v427_v15 = vld [vmem:[%s2456_s1] sm:$0xff] }
  0x21   :  { %v71_v13 = vunpack.c.l.s8.bf16 %v55_v12  ;;  %v429_v16 = vld [vmem:[%s2456_s1 + $0x10] sm:$0xff]  ;;  %v1948_v17 = vld [vmem:[%s2457_s2 + $0x48] sm:$0xff]   ;;  %461 = vperm.xlu0 %1934, %v427_v15   ;;  %v430_v19 = vld [vmem:[%s2456_s1 + $0x18] sm:$0xff]  ;;  %v73_v29 = vunpack.c.h.s8.bf16 %v55_v12 }
  0x22   :  { %471 = vperm.xlu1 %1935, %v429_v16   ;;  %v428_v18 = vld [vmem:[%s2456_s1 + $0x8] sm:$0xff]  ;;  %v1950_v21 = vld [vmem:[%s2457_s2 + $0x40] sm:$0xff]   ;;  %v433_v26 = vld [vmem:[%s2456_s1 + $0x30] sm:$0xff] }
  0x23   :  { %1675 = vmatpush3.bf16.msra.mxu0 %v1939_v4  ;;  %298 = vmatprep.mubr.bf16.mxu0 %v71_v13  ;;  %v1949_v20 = vld [vmem:[%s2457_s2 + $0x8] sm:$0xff]   ;;  %v431_v22 = vld [vmem:[%s2456_s1 + $0x20] sm:$0xff]  ;;  %v434_v28 = vld [vmem:[%s2456_s1 + $0x38] sm:$0xff] }
  0x24   :  { %1676 = vmatprep.subr.bf16.mxu0 %v1940_v5  ;;  %v432_v23 = vld [vmem:[%s2456_s1 + $0x28] sm:$0xff]  ;;  %v1951_v24 = vld [vmem:[%s2457_s2] sm:$0xff]   ;;  %v1952_v32 = vld [vmem:[#allocation5 + $0x38] sm:$0xff]  }
  0x25   :  { %466 = vperm.xlu0 %1934, %v428_v18   ;;  %v54_v25 = vld [vmem:[%s2455_s0] sm:$0xff]  ;;  %v436_v31 = vld [vmem:[%s2456_s1 + $0x48] sm:$0xff]  ;;  %v1953_v33 = vld [vmem:[#allocation5 + $0x30] sm:$0xff]   ;;  %1832 = vmatprep.subr.bf16.mxu1 %v1952_v32 }
  0x26   :  { %476 = vperm.xlu1 %1935, %v430_v19   ;;  %v70_v27 = vunpack.c.l.s8.bf16 %v54_v25  ;;  %v435_v30 = vld [vmem:[%s2456_s1 + $0x40] sm:$0xff]  ;;  %v57_v34 = vld [vmem:[%s2455_s0 + $0x18] sm:$0xff]  ;;  %v1954_v35 = vld [vmem:[#allocation5 + $0x28] sm:$0xff]   ;;  %1833 = vmatpush3.bf16.msra.mxu1 %v1952_v32  ;;  %v72_v38 = vunpack.c.h.s8.bf16 %v54_v25 }
  0x27   :  { %1677 = vmatpush3.bf16.msra.mxu0 %v1941_v6  ;;  %v437_v36 = vld [vmem:[%s2456_s1 + $0x50] sm:$0xff]  ;;  %v438_v37 = vld [vmem:[%s2456_s1 + $0x58] sm:$0xff]  ;;  %1834 = vmatprep.subr.bf16.mxu1 %v1953_v33  ;;  %v75_v39 = vunpack.c.l.s8.bf16 %v57_v34  ;;  %v439_v40 = vld [vmem:[%s2456_s1 + $0x60] sm:$0xff]  ;;  %v77_v46 = vunpack.c.h.s8.bf16 %v57_v34 }
  0x28   :  { %1678 = vmatprep.subr.bf16.mxu0 %v1942_v7  ;;  %v440_v41 = vld [vmem:[%s2456_s1 + $0x68] sm:$0xff]  ;;  %v56_v42 = vld [vmem:[%s2455_s0 + $0x10] sm:$0xff]  ;;  %v442_v44 = vld [vmem:[%s2456_s1 + $0x78] sm:$0xff] }
  0x29   :  { %481 = vperm.xlu0 %1934, %v431_v22   ;;  %v441_v43 = vld [vmem:[%s2456_s1 + $0x70] sm:$0xff]  ;;  %v74_v45 = vunpack.c.l.s8.bf16 %v56_v42  ;;  %v443_v47 = vld [vmem:[%s2456_s1 + $0x80] sm:$0xff]  ;;  %v444_v48 = vld [vmem:[%s2456_s1 + $0x88] sm:$0xff]  ;;  %v76_v51 = vunpack.c.h.s8.bf16 %v56_v42 }
  0x2a   :  { %486 = vperm.xlu1 %1935, %v432_v23   ;;  %1835 = vmatpush3.bf16.msra.mxu1 %v1953_v33  ;;  %v59_v49 = vld [vmem:[%s2455_s0 + $0x28] sm:$0xff]  ;;  %v445_v50 = vld [vmem:[%s2456_s1 + $0x90] sm:$0xff]  ;;  %v446_v52 = vld [vmem:[%s2456_s1 + $0x98] sm:$0xff] }
  0x2b   :  { %1679 = vmatpush3.bf16.msra.mxu0 %v1943_v8  ;;  %1836 = vmatprep.subr.bf16.mxu1 %v1954_v35  ;;  %v79_v53 = vunpack.c.l.s8.bf16 %v59_v49  ;;  %v447_v54 = vld [vmem:[%s2456_s1 + $0xa0] sm:$0xff]  ;;  %v448_v55 = vld [vmem:[%s2456_s1 + $0xa8] sm:$0xff]  ;;  %v449_v57 = vld [vmem:[%s2456_s1 + $0xb0] sm:$0xff]  ;;  %v81_v60 = vunpack.c.h.s8.bf16 %v59_v49 }
  0x2c   :  { %1680 = vmatprep.subr.bf16.mxu0 %v1944_v9  ;;  %v58_v56 = vld [vmem:[%s2455_s0 + $0x20] sm:$0xff]  ;;  %v450_v59 = vld [vmem:[%s2456_s1 + $0xb8] sm:$0xff]  ;;  %v452_v62 = vld [vmem:[%s2456_s1 + $0xc8] sm:$0xff] }
  0x2d   :  { %491 = vperm.xlu0 %1934, %v433_v26   ;;  %v78_v58 = vunpack.c.l.s8.bf16 %v58_v56  ;;  %v451_v61 = vld [vmem:[%s2456_s1 + $0xc0] sm:$0xff]  ;;  %v61_v63 = vld [vmem:[%s2455_s0 + $0x38] sm:$0xff]  ;;  %v453_v0 = vld [vmem:[%s2456_s1 + $0xd0] sm:$0xff]  ;;  %v80_v1 = vunpack.c.h.s8.bf16 %v58_v56 }
  0x2e   :  { %496 = vperm.xlu1 %1935, %v434_v28   ;;  %1837 = vmatpush3.bf16.msra.mxu1 %v1954_v35  ;;  %v454_v2 = vld [vmem:[%s2456_s1 + $0xd8] sm:$0xff]  ;;  %v83_v3 = vunpack.c.l.s8.bf16 %v61_v63  ;;  %v455_v4 = vld [vmem:[%s2456_s1 + $0xe0] sm:$0xff]  ;;  %v456_v5 = vld [vmem:[%s2456_s1 + $0xe8] sm:$0xff] }
  0x2f   :  { %1681 = vmatpush3.bf16.msra.mxu0 %v1945_v10  ;;  %v60_v6 = vld [vmem:[%s2455_s0 + $0x30] sm:$0xff]  ;;  %v458_v9 = vld [vmem:[%s2456_s1 + $0xf8] sm:$0xff]  ;;  %v85_v10 = vunpack.c.h.s8.bf16 %v61_v63  ;;  %v67_v28 = vld [vmem:[%s2455_s0 + $0x68] sm:$0xff] }
  0x30   :  { %1682 = vmatprep.subr.bf16.mxu0 %v1946_v11  ;;  %v457_v7 = vld [vmem:[%s2456_s1 + $0xf0] sm:$0xff]  ;;  %v82_v8 = vunpack.c.l.s8.bf16 %v60_v6  ;;  %v63_v11 = vld [vmem:[%s2455_s0 + $0x48] sm:$0xff]  ;;  %v84_v12 = vunpack.c.h.s8.bf16 %v60_v6  ;;  %v65_v18 = vld [vmem:[%s2455_s0 + $0x58] sm:$0xff]  ;;  %v97_v33 = vunpack.c.h.s8.bf16 %v67_v28 }
  0x31   :  { %501 = vperm.xlu0 %1934, %v435_v30   ;;  %v87_v13 = vunpack.c.l.s8.bf16 %v63_v11  ;;  %v89_v16 = vunpack.c.h.s8.bf16 %v63_v11  ;;  %v1956_v19 = vld [vmem:[#allocation5 + $0x18] sm:$0xff]   ;;  %v1957_v22 = vld [vmem:[#allocation5 + $0x10] sm:$0xff]   ;;  %v93_v26 = vunpack.c.h.s8.bf16 %v65_v18  ;;  %v95_v30 = vunpack.c.l.s8.bf16 %v67_v28 }
  0x32   :  { %506 = vperm.xlu1 %1935, %v436_v31   ;;  %v64_v23 = vld [vmem:[%s2455_s0 + $0x50] sm:$0xff]  ;;  %v66_v31 = vld [vmem:[%s2455_s0 + $0x60] sm:$0xff]  ;;  %v69_v34 = vld [vmem:[%s2455_s0 + $0x78] sm:$0xff] }
  0x33   :  { %1683 = vmatpush3.bf16.msra.mxu0 %v1947_v14  ;;  %v62_v14 = vld [vmem:[%s2455_s0 + $0x40] sm:$0xff]  ;;  %v90_v25 = vunpack.c.l.s8.bf16 %v64_v23  ;;  %v94_v32 = vunpack.c.l.s8.bf16 %v66_v31  ;;  %v96_v35 = vunpack.c.h.s8.bf16 %v66_v31  ;;  %v1965_v28 = vld [vmem:[#allocation2 + $0x10] sm:$0xff]  }
  0x34   :  { %1684 = vmatprep.subr.bf16.mxu0 %v1948_v17  ;;  %v86_v15 = vunpack.c.l.s8.bf16 %v62_v14  ;;  %v1955_v17 = vld [vmem:[#allocation5 + $0x20] sm:$0xff]  }
  0x35   :  { %511 = vperm.xlu0 %1934, %v437_v36   ;;  %1838 = vmatprep.subr.bf16.mxu1 %v1955_v17  ;;  %v99_v36 = vunpack.c.l.s8.bf16 %v69_v34 }
  0x36   :  { %516 = vperm.xlu1 %1935, %v438_v37   ;;  %1839 = vmatpush3.bf16.msra.mxu1 %v1955_v17  ;;  %v68_v37 = vld [vmem:[%s2455_s0 + $0x70] sm:$0xff] }
  0x37   :  { %1685 = vmatpush3.bf16.msra.mxu0 %v1949_v20  ;;  %v88_v20 = vunpack.c.h.s8.bf16 %v62_v14  ;;  %1840 = vmatprep.subr.bf16.mxu1 %v1956_v19 }
  0x38   :  { %1686 = vmatprep.subr.bf16.mxu0 %v1950_v21  ;;  %v91_v21 = vunpack.c.l.s8.bf16 %v65_v18 }
  0x39   :  { %521 = vperm.xlu0 %1934, %v439_v40   ;;  %v100_v40 = vunpack.c.h.s8.bf16 %v68_v37 }
  0x3a   :  { %526 = vperm.xlu1 %1935, %v440_v41   ;;  %1841 = vmatpush3.bf16.msra.mxu1 %v1956_v19  ;;  %v1960_v41 = vld [vmem:[#allocation2 + $0x38] sm:$0xff]  }
  0x3b   :  { %1687 = vmatpush3.bf16.msra.mxu0 %v1951_v24  ;;  %1842 = vmatprep.subr.bf16.mxu1 %v1957_v22  ;;  %v1958_v24 = vld [vmem:[#allocation5 + $0x8] sm:$0xff]  }
  0x3d   :  { %531 = vperm.xlu0 %1934, %v441_v43  }
  0x3e   :  { %299 = vmatmul.mubr.bf16.vlgmr.msra.gmra.mxu0 %v70_v27  ;;  %536 = vperm.xlu1 %1935, %v442_v44   ;;  %v1959_v27 = vld [vmem:[#allocation5] sm:$0xff]  }
  0x3f   :  { %306 = vmatprep.mubr.bf16.mxu0 %v73_v29  ;;  %1843 = vmatpush3.bf16.msra.mxu1 %v1957_v22  ;;  %v92_v29 = vunpack.c.h.s8.bf16 %v64_v23 }
  0x40   :  { %1844 = vmatprep.subr.bf16.mxu1 %v1958_v24 }
  0x41   :  { %541 = vperm.xlu0 %1934, %v443_v47  }
  0x42   :  { %546 = vperm.xlu1 %1935, %v444_v48  }
  0x43   :  { %1845 = vmatpush3.bf16.msra.mxu1 %v1958_v24 }
  0x44   :  { %1846 = vmatprep.subr.bf16.mxu1 %v1959_v27 }
  0x45   :  { %551 = vperm.xlu0 %1934, %v445_v50  }
  0x46   :  { %307 = vmatmul.mubr.bf16.gmra.mxu0 %v72_v38  ;;  %556 = vperm.xlu1 %1935, %v446_v52   ;;  %v98_v38 = vunpack.c.l.s8.bf16 %v68_v37 }
  0x47   :  { %314 = vmatprep.mubr.bf16.mxu0 %v75_v39  ;;  %1847 = vmatpush3.bf16.msra.mxu1 %v1959_v27  ;;  %v101_v39 = vunpack.c.h.s8.bf16 %v69_v34  ;;  %v1966_v34 = vld [vmem:[#allocation2 + $0x8] sm:$0xff]  }
  0x48   :  { %1880 = vmatprep.subr.bf16.mxu1 %v1960_v41 }
  0x49   :  { %561 = vperm.xlu0 %1934, %v447_v54  }
  0x4a   :  { %566 = vperm.xlu1 %1935, %v448_v55  }
  0x4d   :  { %571 = vperm.xlu0 %1934, %v449_v57  }
  0x4e   :  { %315 = vmatmul.mubr.bf16.gmra.mxu0 %v74_v45  ;;  %576 = vperm.xlu1 %1935, %v450_v59  }
  0x4f   :  { %322 = vmatprep.mubr.bf16.mxu0 %v77_v46 }
  0x51   :  { %581 = vperm.xlu0 %1934, %v451_v61  }
  0x52   :  { %586 = vperm.xlu1 %1935, %v452_v62  }
  0x55   :  { %591 = vperm.xlu0 %1934, %v453_v0  }
  0x56   :  { %323 = vmatmul.mubr.bf16.gmra.mxu0 %v76_v51  ;;  %596 = vperm.xlu1 %1935, %v454_v2   ;;  %v1961_v2 = vld [vmem:[#allocation2 + $0x30] sm:$0xff]  }
  0x57   :  { %330 = vmatprep.mubr.bf16.mxu0 %v79_v53 }
  0x59   :  { %601 = vperm.xlu0 %1934, %v455_v4  }
  0x5a   :  { %606 = vperm.xlu1 %1935, %v456_v5  }
  0x5d   :  { %611 = vperm.xlu0 %1934, %v457_v7  }
  0x5e   :  { %331 = vmatmul.mubr.bf16.gmra.mxu0 %v78_v58  ;;  %616 = vperm.xlu1 %1935, %v458_v9  }
  0x5f   :  { %338 = vmatprep.mubr.bf16.mxu0 %v81_v60 }
  0x66   :  { %339 = vmatmul.mubr.bf16.gmra.mxu0 %v80_v1 }
  0x67   :  { %346 = vmatprep.mubr.bf16.mxu0 %v83_v3 }
  0x6e   :  { %347 = vmatmul.mubr.bf16.gmra.mxu0 %v82_v8  ;;  %v1962_v8 = vld [vmem:[#allocation2 + $0x28] sm:$0xff]  }
  0x6f   :  { %354 = vmatprep.mubr.bf16.mxu0 %v85_v10 }
  0x76   :  { %355 = vmatmul.mubr.bf16.gmra.mxu0 %v84_v12 }
  0x77   :  { %362 = vmatprep.mubr.bf16.mxu0 %v87_v13 }
  0x7e   :  { %363 = vmatmul.mubr.bf16.gmra.mxu0 %v86_v15  ;;  %v1963_v15 = vld [vmem:[#allocation2 + $0x20] sm:$0xff]  }
  0x7f   :  { %370 = vmatprep.mubr.bf16.mxu0 %v89_v16 }
  0x86   :  { %371 = vmatmul.mubr.bf16.gmra.mxu0 %v88_v20 }
  0x87   :  { %378 = vmatprep.mubr.bf16.mxu0 %v91_v21  ;;  %v1964_v21 = vld [vmem:[#allocation2 + $0x18] sm:$0xff]  }
  0x8e   :  { %379 = vmatmul.mubr.bf16.gmra.mxu0 %v90_v25 }
  0x8f   :  { %386 = vmatprep.mubr.bf16.mxu0 %v93_v26 }
  0x96   :  { %387 = vmatmul.mubr.bf16.gmra.mxu0 %v92_v29 }
  0x97   :  { %394 = vmatprep.mubr.bf16.mxu0 %v95_v30 }
  0x9c   :  { %v462_v43 = vpop.permute.xlu0 %461 }
  0x9d   :  { %v472_v53 = vpop.permute.xlu1 %471 }
  0x9e   :  { %395 = vmatmul.mubr.bf16.gmra.mxu0 %v94_v32 }
  0x9f   :  { %402 = vmatprep.mubr.bf16.mxu0 %v97_v33 }
  0xa0   :  { %v467_v48 = vpop.permute.xlu0 %466 }
  0xa1   :  { %v477_v60 = vpop.permute.xlu1 %476 }
  0xa4   :  { %v482_v6 = vpop.permute.xlu0 %481 }
  0xa5   :  { %v487_v9 = vpop.permute.xlu1 %486 }
  0xa6   :  { %403 = vmatmul.mubr.bf16.gmra.mxu0 %v96_v35 }
  0xa7   :  { %410 = vmatprep.mubr.bf16.mxu0 %v99_v36 }
  0xa8   :  { %v492_v19 = vpop.permute.xlu0 %491 }
  0xa9   :  { %v497_v22 = vpop.permute.xlu1 %496 }
  0xac   :  { %v502_v32 = vpop.permute.xlu0 %501 }
  0xad   :  { %v507_v35 = vpop.permute.xlu1 %506 }
  0xae   :  { %411 = vmatmul.mubr.bf16.gmra.mxu0 %v98_v38 }
  0xaf   :  { %418 = vmatprep.mubr.bf16.mxu0 %v101_v39 }
  0xb6   :  { %419 = vmatmul.mubr.bf16.gmra.mxu0 %v100_v40 }
  0xfe   :  { %v1688_v42 = vpop.f32.mrf.mxu0 }
 0x100   :  { %v1689_v44 = vpop.f32.mrf.mxu0 }
 0x101   :  { %v1690_v46 = vadd.f32 %v1689_v44, %v1688_v42 }
 0x102   :  { %v1691_v45 = vpop.f32.mrf.mxu0 }
 0x103   :  { %v619_v51 = vmul.f32 %v1690_v46, %v462_v43 }
 0x104   :  { %v1692_v47 = vpop.f32.mrf.mxu0 }
 0x105   :  { %v1693_v49 = vadd.f32 %v1692_v47, %v1691_v45  ;;  %v512_v45 = vpop.permute.xlu0 %511  ;;  %v517_v47 = vpop.permute.xlu1 %516 }
 0x106   :  { %v1694_v50 = vpop.f32.mrf.mxu0 }
 0x107   :  { %v620_v52 = vmul.f32 %v1693_v49, %v467_v48 }
 0x108   :  { %v1695_v54 = vpop.f32.mrf.mxu0 }
 0x109   :  { %v667_v55 = vpack.c.bf16 %v620_v52, %v619_v51  ;;  %v1696_v57 = vadd.f32 %v1695_v54, %v1694_v50 }
 0x10a   :  { %v1697_v56 = vpop.f32.mrf.mxu0 }
 0x10b   :  { %1848 = vmatprep.mubr.bf16.mxu1 %v667_v55  ;;  %v621_v62 = vmul.f32 %v1696_v57, %v472_v53 }
 0x10c   :  { %v1698_v58 = vpop.f32.mrf.mxu0 }
 0x10d   :  { %v1699_v59 = vadd.f32 %v1698_v58, %v1697_v56  ;;  %v522_v56 = vpop.permute.xlu0 %521  ;;  %v527_v58 = vpop.permute.xlu1 %526 }
 0x10e   :  { %v1700_v61 = vpop.f32.mrf.mxu0 }
 0x10f   :  { %v622_v63 = vmul.f32 %v1699_v59, %v477_v60 }
 0x110   :  { %v1701_v0 = vpop.f32.mrf.mxu0 }
 0x111   :  { %v668_v1 = vpack.c.bf16 %v622_v63, %v621_v62  ;;  %v1702_v4 = vadd.f32 %v1701_v0, %v1700_v61 }
 0x112   :  { %v1703_v3 = vpop.f32.mrf.mxu0 }
 0x113   :  { %1849 = vmatmul.mubr.bf16.vlgmr.msra.gmra.mxu1 %v668_v1  ;;  %v623_v11 = vmul.f32 %v1702_v4, %v482_v6 }
 0x114   :  { %v1704_v5 = vpop.f32.mrf.mxu0  ;;  %1881 = vmatpush3.bf16.msra.mxu1 %v1960_v41  ;;  %v1967_v41 = vld [vmem:[#allocation2] sm:$0xff]  }
 0x115   :  { %v1705_v7 = vadd.f32 %v1704_v5, %v1703_v3  ;;  %1882 = vmatprep.subr.bf16.mxu1 %v1961_v2  ;;  %v532_v3 = vpop.permute.xlu0 %531  ;;  %v537_v5 = vpop.permute.xlu1 %536 }
 0x116   :  { %v1706_v10 = vpop.f32.mrf.mxu0 }
 0x117   :  { %v624_v12 = vmul.f32 %v1705_v7, %v487_v9 }
 0x118   :  { %v1707_v13 = vpop.f32.mrf.mxu0  ;;  %1883 = vmatpush3.bf16.msra.mxu1 %v1961_v2 }
 0x119   :  { %v669_v14 = vpack.c.bf16 %v624_v12, %v623_v11  ;;  %1884 = vmatprep.subr.bf16.mxu1 %v1962_v8  ;;  %v1708_v17 = vadd.f32 %v1707_v13, %v1706_v10 }
 0x11a   :  { %v1709_v16 = vpop.f32.mrf.mxu0 }
 0x11b   :  { %1852 = vmatprep.mubr.bf16.mxu1 %v669_v14  ;;  %v625_v24 = vmul.f32 %v1708_v17, %v492_v19  ;;  %v542_v14 = vpop.permute.xlu0 %541 }
 0x11c   :  { %v1710_v18 = vpop.f32.mrf.mxu0  ;;  %1885 = vmatpush3.bf16.msra.mxu1 %v1962_v8 }
 0x11d   :  { %v1711_v20 = vadd.f32 %v1710_v18, %v1709_v16  ;;  %1886 = vmatprep.subr.bf16.mxu1 %v1963_v15  ;;  %v547_v16 = vpop.permute.xlu1 %546 }
 0x11e   :  { %v1712_v23 = vpop.f32.mrf.mxu0 }
 0x11f   :  { %v626_v25 = vmul.f32 %v1711_v20, %v497_v22 }
 0x120   :  { %v1713_v26 = vpop.f32.mrf.mxu0  ;;  %1887 = vmatpush3.bf16.msra.mxu1 %v1963_v15 }
 0x121   :  { %v670_v27 = vpack.c.bf16 %v626_v25, %v625_v24  ;;  %1888 = vmatprep.subr.bf16.mxu1 %v1964_v21  ;;  %v1714_v30 = vadd.f32 %v1713_v26, %v1712_v23  ;;  %v552_v25 = vpop.permute.xlu0 %551 }
 0x122   :  { %v1715_v29 = vpop.f32.mrf.mxu0 }
 0x123   :  { %1853 = vmatmul.mubr.bf16.gmra.mxu1 %v670_v27  ;;  %v627_v37 = vmul.f32 %v1714_v30, %v502_v32  ;;  %v557_v27 = vpop.permute.xlu1 %556 }
 0x124   :  { %v1716_v31 = vpop.f32.mrf.mxu0  ;;  %1889 = vmatpush3.bf16.msra.mxu1 %v1964_v21 }
 0x125   :  { %v1717_v33 = vadd.f32 %v1716_v31, %v1715_v29  ;;  %1890 = vmatprep.subr.bf16.mxu1 %v1965_v28 }
 0x126   :  { %v1718_v36 = vpop.f32.mrf.mxu0 }
 0x127   :  { %v628_v38 = vmul.f32 %v1717_v33, %v507_v35 }
 0x128   :  { %v1719_v39 = vpop.f32.mrf.mxu0  ;;  %1891 = vmatpush3.bf16.msra.mxu1 %v1965_v28 }
 0x129   :  { %v671_v40 = vpack.c.bf16 %v628_v38, %v627_v37  ;;  %1892 = vmatprep.subr.bf16.mxu1 %v1966_v34  ;;  %v1720_v43 = vadd.f32 %v1719_v39, %v1718_v36  ;;  %v562_v36 = vpop.permute.xlu0 %561  ;;  %v567_v38 = vpop.permute.xlu1 %566 }
 0x12a   :  { %v1721_v42 = vpop.f32.mrf.mxu0 }
 0x12b   :  { %1856 = vmatprep.mubr.bf16.mxu1 %v671_v40  ;;  %v629_v49 = vmul.f32 %v1720_v43, %v512_v45 }
 0x12c   :  { %v1722_v44 = vpop.f32.mrf.mxu0  ;;  %1893 = vmatpush3.bf16.msra.mxu1 %v1966_v34 }
 0x12d   :  { %v1723_v46 = vadd.f32 %v1722_v44, %v1721_v42  ;;  %1894 = vmatprep.subr.bf16.mxu1 %v1967_v41 }
 0x12e   :  { %v1724_v48 = vpop.f32.mrf.mxu0 }
 0x12f   :  { %v630_v50 = vmul.f32 %v1723_v46, %v517_v47  ;;  %v572_v47 = vpop.permute.xlu0 %571 }
 0x130   :  { %v1725_v51 = vpop.f32.mrf.mxu0  ;;  %1895 = vmatpush3.bf16.msra.mxu1 %v1967_v41 }
 0x131   :  { %v672_v52 = vpack.c.bf16 %v630_v50, %v629_v49  ;;  %v1726_v54 = vadd.f32 %v1725_v51, %v1724_v48  ;;  %v577_v49 = vpop.permute.xlu1 %576 }
 0x132   :  { %v1727_v53 = vpop.f32.mrf.mxu0 }
 0x133   :  { %1857 = vmatmul.mubr.bf16.gmra.mxu1 %v672_v52  ;;  %v631_v60 = vmul.f32 %v1726_v54, %v522_v56 }
 0x134   :  { %v1728_v55 = vpop.f32.mrf.mxu0 }
 0x135   :  { %v1729_v57 = vadd.f32 %v1728_v55, %v1727_v53 }
 0x136   :  { %v1730_v59 = vpop.f32.mrf.mxu0 }
 0x137   :  { %v632_v61 = vmul.f32 %v1729_v57, %v527_v58  ;;  %v582_v58 = vpop.permute.xlu0 %581 }
 0x138   :  { %v1731_v62 = vpop.f32.mrf.mxu0 }
 0x139   :  { %v673_v63 = vpack.c.bf16 %v632_v61, %v631_v60  ;;  %v1732_v1 = vadd.f32 %v1731_v62, %v1730_v59  ;;  %v587_v60 = vpop.permute.xlu1 %586 }
 0x13a   :  { %v1733_v0 = vpop.f32.mrf.mxu0 }
 0x13b   :  { %1860 = vmatprep.mubr.bf16.mxu1 %v673_v63  ;;  %v633_v7 = vmul.f32 %v1732_v1, %v532_v3 }
 0x13c   :  { %v1734_v2 = vpop.f32.mrf.mxu0 }
 0x13d   :  { %v1735_v4 = vadd.f32 %v1734_v2, %v1733_v0 }
 0x13e   :  { %v1736_v6 = vpop.f32.mrf.mxu0 }
 0x13f   :  { %v634_v8 = vmul.f32 %v1735_v4, %v537_v5  ;;  %v592_v5 = vpop.permute.xlu0 %591 }
 0x140   :  { %v1737_v9 = vpop.f32.mrf.mxu0 }
 0x141   :  { %v674_v10 = vpack.c.bf16 %v634_v8, %v633_v7  ;;  %v1738_v12 = vadd.f32 %v1737_v9, %v1736_v6  ;;  %v597_v7 = vpop.permute.xlu1 %596 }
 0x142   :  { %v1739_v11 = vpop.f32.mrf.mxu0 }
 0x143   :  { %1861 = vmatmul.mubr.bf16.gmra.mxu1 %v674_v10  ;;  %v635_v18 = vmul.f32 %v1738_v12, %v542_v14 }
 0x144   :  { %v1740_v13 = vpop.f32.mrf.mxu0 }
 0x145   :  { %v1741_v15 = vadd.f32 %v1740_v13, %v1739_v11 }
 0x146   :  { %v1742_v17 = vpop.f32.mrf.mxu0 }
 0x147   :  { %v636_v19 = vmul.f32 %v1741_v15, %v547_v16  ;;  %v602_v16 = vpop.permute.xlu0 %601 }
 0x148   :  { %v1743_v20 = vpop.f32.mrf.mxu0 }
 0x149   :  { %v675_v21 = vpack.c.bf16 %v636_v19, %v635_v18  ;;  %v1744_v23 = vadd.f32 %v1743_v20, %v1742_v17  ;;  %v607_v18 = vpop.permute.xlu1 %606 }
 0x14a   :  { %v1745_v22 = vpop.f32.mrf.mxu0 }
 0x14b   :  { %1864 = vmatprep.mubr.bf16.mxu1 %v675_v21  ;;  %v637_v29 = vmul.f32 %v1744_v23, %v552_v25 }
 0x14c   :  { %v1746_v24 = vpop.f32.mrf.mxu0 }
 0x14d   :  { %v1747_v26 = vadd.f32 %v1746_v24, %v1745_v22 }
 0x14e   :  { %v1748_v28 = vpop.f32.mrf.mxu0 }
 0x14f   :  { %v638_v30 = vmul.f32 %v1747_v26, %v557_v27 }
 0x150   :  { %v1749_v31 = vpop.f32.mrf.mxu0 }
 0x151   :  { %v676_v32 = vpack.c.bf16 %v638_v30, %v637_v29  ;;  %v1750_v34 = vadd.f32 %v1749_v31, %v1748_v28  ;;  %v612_v28 = vpop.permute.xlu0 %611  ;;  %v617_v29 = vpop.permute.xlu1 %616 }
 0x152   :  { %v1751_v33 = vpop.f32.mrf.mxu0 }
 0x153   :  { %1865 = vmatmul.mubr.bf16.gmra.mxu1 %v676_v32  ;;  %v639_v40 = vmul.f32 %v1750_v34, %v562_v36  ;;  %v1968_v32 = vld [vmem:[%s2457_s2] sm:$0xff]   ;;  %v1969_v34 = vld [vmem:[%s2457_s2 + $0x8] sm:$0xff]   ;;  %v1971_v36 = vld [vmem:[%s2457_s2 + $0x18] sm:$0xff]  }
 0x154   :  { %v1752_v35 = vpop.f32.mrf.mxu0 }
 0x155   :  { %v1753_v37 = vadd.f32 %v1752_v35, %v1751_v33  ;;  %v1970_v35 = vld [vmem:[%s2457_s2 + $0x10] sm:$0xff]  }
 0x156   :  { %v1754_v39 = vpop.f32.mrf.mxu0 }
 0x157   :  { %v640_v41 = vmul.f32 %v1753_v37, %v567_v38  ;;  %v1972_v37 = vld [vmem:[%s2457_s2 + $0x20] sm:$0xff]   ;;  %v1973_v38 = vld [vmem:[%s2457_s2 + $0x28] sm:$0xff]  }
 0x158   :  { %v1755_v42 = vpop.f32.mrf.mxu0 }
 0x159   :  { %v677_v43 = vpack.c.bf16 %v640_v41, %v639_v40  ;;  %v1756_v45 = vadd.f32 %v1755_v42, %v1754_v39  ;;  %v1974_v39 = vld [vmem:[%s2457_s2 + $0x30] sm:$0xff]   ;;  %v1975_v40 = vld [vmem:[%s2457_s2 + $0x38] sm:$0xff]   ;;  %v1976_v41 = vld [vmem:[%s2457_s2 + $0x40] sm:$0xff]  }
 0x15a   :  { %v1757_v44 = vpop.f32.mrf.mxu0  ;;  %v1977_v42 = vld [vmem:[%s2457_s2 + $0x48] sm:$0xff]  }
 0x15b   :  { %1868 = vmatprep.mubr.bf16.mxu1 %v677_v43  ;;  %v641_v51 = vmul.f32 %v1756_v45, %v572_v47  ;;  %v1978_v43 = vld [vmem:[%s2457_s2 + $0x50] sm:$0xff]   ;;  %v1980_v45 = vld [vmem:[%s2457_s2 + $0x60] sm:$0xff]  }
 0x15c   :  { %v1758_v46 = vpop.f32.mrf.mxu0  ;;  %v1982_v47 = vld [vmem:[%s2457_s2 + $0x70] sm:$0xff]  }
 0x15d   :  { %v1759_v48 = vadd.f32 %v1758_v46, %v1757_v44  ;;  %v1979_v44 = vld [vmem:[%s2457_s2 + $0x58] sm:$0xff]   ;;  %v1981_v46 = vld [vmem:[%s2457_s2 + $0x68] sm:$0xff]  }
 0x15e   :  { %v1760_v50 = vpop.f32.mrf.mxu0 }
 0x15f   :  { %v642_v52 = vmul.f32 %v1759_v48, %v577_v49  ;;  %v1983_v48 = vld [vmem:[%s2457_s2 + $0x78] sm:$0xff]  }
 0x160   :  { %v1761_v53 = vpop.f32.mrf.mxu0 }
 0x161   :  { %v678_v54 = vpack.c.bf16 %v642_v52, %v641_v51  ;;  %v1762_v56 = vadd.f32 %v1761_v53, %v1760_v50 }
 0x162   :  { %v1763_v55 = vpop.f32.mrf.mxu0 }
 0x163   :  { %1869 = vmatmul.mubr.bf16.gmra.mxu1 %v678_v54  ;;  %v643_v62 = vmul.f32 %v1762_v56, %v582_v58 }
 0x164   :  { %v1764_v57 = vpop.f32.mrf.mxu0 }
 0x165   :  { %v1765_v59 = vadd.f32 %v1764_v57, %v1763_v55 }
 0x166   :  { %v1766_v61 = vpop.f32.mrf.mxu0 }
 0x167   :  { %v644_v63 = vmul.f32 %v1765_v59, %v587_v60 }
 0x168   :  { %v1767_v0 = vpop.f32.mrf.mxu0 }
 0x169   :  { %v679_v1 = vpack.c.bf16 %v644_v63, %v643_v62  ;;  %v1768_v3 = vadd.f32 %v1767_v0, %v1766_v61 }
 0x16a   :  { %v1769_v2 = vpop.f32.mrf.mxu0 }
 0x16b   :  { %1872 = vmatprep.mubr.bf16.mxu1 %v679_v1  ;;  %v645_v9 = vmul.f32 %v1768_v3, %v592_v5 }
 0x16c   :  { %v1770_v4 = vpop.f32.mrf.mxu0 }
 0x16d   :  { %v1771_v6 = vadd.f32 %v1770_v4, %v1769_v2 }
 0x16e   :  { %v1772_v8 = vpop.f32.mrf.mxu0 }
 0x16f   :  { %v646_v10 = vmul.f32 %v1771_v6, %v597_v7 }
 0x170   :  { %v1773_v11 = vpop.f32.mrf.mxu0 }
 0x171   :  { %v680_v12 = vpack.c.bf16 %v646_v10, %v645_v9  ;;  %v1774_v14 = vadd.f32 %v1773_v11, %v1772_v8 }
 0x172   :  { %v1775_v13 = vpop.f32.mrf.mxu0 }
 0x173   :  { %1873 = vmatmul.mubr.bf16.gmra.mxu1 %v680_v12  ;;  %v647_v20 = vmul.f32 %v1774_v14, %v602_v16 }
 0x174   :  { %v1776_v15 = vpop.f32.mrf.mxu0 }
 0x175   :  { %v1777_v17 = vadd.f32 %v1776_v15, %v1775_v13 }
 0x176   :  { %v1778_v19 = vpop.f32.mrf.mxu0 }
 0x177   :  { %v648_v21 = vmul.f32 %v1777_v17, %v607_v18 }
 0x178   :  { %v1779_v22 = vpop.f32.mrf.mxu0 }
 0x179   :  { %v681_v23 = vpack.c.bf16 %v648_v21, %v647_v20  ;;  %v1780_v25 = vadd.f32 %v1779_v22, %v1778_v19  ;;  %v2392_v19 = vld [vmem:[%s2460_s5] ss:$0 sm:$0xff]  ;;  %s2055_s5 = smov [#allocation7]  }
 0x17a   :  { %v1781_v24 = vpop.f32.mrf.mxu0  ;;  %s1449_s20 = sshll.u32 %s2055_s5, 4  ;;  %s1450_s20 = int_to_ptr.vmem [resolvable:$true] %s1449_s20 }
 0x17b   :  { %1876 = vmatprep.mubr.bf16.mxu1 %v681_v23  ;;  %v649_v30 = vmul.f32 %v1780_v25, %v612_v28  ;;  %s2024_s21 = scalar_lea.vmem %s1450_s20, 2048  ;;  %p2029_p11 = scmp.lt.s32.totalorder %s1450_s20, %s1450_s20 }
 0x17c   :  { %v1782_v26 = vpop.f32.mrf.mxu0  ;;  %p2025_p10 = scmp.ne.s32.totalorder %s1450_s20, %s2024_s21  ;;  %p2030_p12 = scmp.lt.s32.totalorder %s2024_s21, %s2024_s21 }
 0x17d   :  { %v1783_v27 = vadd.f32 %v1782_v26, %v1781_v24 }
 0x17e   :  { %p2031_p13 = por %p2030_p12, %p2029_p11 }
 0x17f   :  { %v650_v31 = vmul.f32 %v1783_v27, %v617_v29 }
 0x180   :  { %p2032_p0 = pnand %p2031_p13, %p2025_p10 }
 0x181   :  { %v682_v33 = vpack.c.bf16 %v650_v31, %v649_v30 }
 0x183   :  { %1877 = vmatmul.mubr.bf16.gmra.mxu1 %v682_v33 }
 0x184   :  { %1896 = vmatprep.mubr.bf16.mxu1 %v1968_v32 }
 0x18b   :  { %1897 = vmatmul.mubr.bf16.vlgmr.msra.gmra.mxu1 %v1969_v34 }
 0x18c   :  { %1900 = vmatprep.mubr.bf16.mxu1 %v1970_v35 }
 0x193   :  { %1901 = vmatmul.mubr.bf16.gmra.mxu1 %v1971_v36 }
 0x194   :  { %1904 = vmatprep.mubr.bf16.mxu1 %v1972_v37 }
 0x19b   :  { %1905 = vmatmul.mubr.bf16.gmra.mxu1 %v1973_v38 }
 0x19c   :  { %1908 = vmatprep.mubr.bf16.mxu1 %v1974_v39 }
 0x1a3   :  { %1909 = vmatmul.mubr.bf16.gmra.mxu1 %v1975_v40 }
 0x1a4   :  { %1912 = vmatprep.mubr.bf16.mxu1 %v1976_v41 }
 0x1ab   :  { %1913 = vmatmul.mubr.bf16.gmra.mxu1 %v1977_v42 }
 0x1ac   :  { %1916 = vmatprep.mubr.bf16.mxu1 %v1978_v43 }
 0x1b3   :  { %1917 = vmatmul.mubr.bf16.gmra.mxu1 %v1979_v44 }
 0x1b4   :  { %1920 = vmatprep.mubr.bf16.mxu1 %v1980_v45 }
 0x1bb   :  { %1921 = vmatmul.mubr.bf16.gmra.mxu1 %v1981_v46 }
 0x1bc   :  { %1924 = vmatprep.mubr.bf16.mxu1 %v1982_v47 }
 0x1c3   :  { %1925 = vmatmul.mubr.bf16.gmra.mxu1 %v1983_v48 }
 0x1d3   :  { %v1850_v49 = vpop.f32.mrf.mxu1 }
 0x1d5   :  { %v781_v50 = vpop.f32.mrf.mxu1 }
 0x1d7   :  { %v1851_v51 = vpop.f32.mrf.mxu1 }
 0x1d9   :  { %v784_v52 = vpop.f32.mrf.mxu1 }
 0x1e3   :  { %v1854_v53 = vpop.f32.mrf.mxu1 }
 0x1e5   :  { %v797_v54 = vpop.f32.mrf.mxu1 }
 0x1e7   :  { %v1855_v55 = vpop.f32.mrf.mxu1 }
 0x1e9   :  { %v800_v56 = vpop.f32.mrf.mxu1 }
 0x1f3   :  { %v1858_v57 = vpop.f32.mrf.mxu1 }
 0x1f5   :  { %v2343_v58 = vpop.f32.mrf.mxu1 }
 0x1f7   :  { %v2345_v59 = vpop.f32.mrf.mxu1 }
 0x1f9   :  { %v2347_v60 = vpop.f32.mrf.mxu1 }
 0x203   :  { %v2349_v61 = vpop.f32.mrf.mxu1 }
 0x205   :  { %v2351_v62 = vpop.f32.mrf.mxu1 }
 0x207   :  { %v2353_v63 = vpop.f32.mrf.mxu1 }
 0x209   :  { %v2355_v0 = vpop.f32.mrf.mxu1 }
 0x213   :  { %v2357_v1 = vpop.f32.mrf.mxu1 }
 0x215   :  { %v2359_v2 = vpop.f32.mrf.mxu1 }
 0x217   :  { %v2361_v3 = vpop.f32.mrf.mxu1 }
 0x219   :  { %v2363_v4 = vpop.f32.mrf.mxu1 }
 0x223   :  { %v2365_v5 = vpop.f32.mrf.mxu1 }
 0x225   :  { %v2367_v6 = vpop.f32.mrf.mxu1 }
 0x227   :  { %v2369_v7 = vpop.f32.mrf.mxu1 }
 0x229   :  { %v2371_v8 = vpop.f32.mrf.mxu1 }
 0x233   :  { %v2373_v9 = vpop.f32.mrf.mxu1 }
 0x235   :  { %v2375_v10 = vpop.f32.mrf.mxu1 }
 0x237   :  { %v2377_v11 = vpop.f32.mrf.mxu1 }
 0x239   :  { %v2379_v12 = vpop.f32.mrf.mxu1 }
 0x243   :  { %v2381_v13 = vpop.f32.mrf.mxu1 }
 0x245   :  { %v2383_v14 = vpop.f32.mrf.mxu1 }
 0x247   :  { %v2385_v15 = vpop.f32.mrf.mxu1 }
 0x249   :  { %v2387_v16 = vpop.f32.mrf.mxu1 }
 0x24b   :  { %v1898_v17 = vpop.f32.mrf.mxu1 }
 0x24c   :  { %v1095_v18 = vadd.f32 %v1898_v17, %v1850_v49 }
 0x24d   :  { %v1086_v20 = vpop.f32.mrf.mxu1 }
 0x24e   :  { %v1087_v21 = vadd.f32 %v1086_v20, %v781_v50  ;;  %v1222_v23 = vadd.f32 %v2392_v19, %v1095_v18 }
 0x24f   :  { %v1899_v22 = vpop.f32.mrf.mxu1 }
 0x250   :  { %v1098_v24 = vadd.f32 %v1899_v22, %v1851_v51  ;;  %v1220_v26 = vadd.f32 %v2392_v19, %v1087_v21  ;;  %v1254_v30 = vmax.f32 %v1222_v23, 0.0 }
 0x251   :  { %v1089_v25 = vpop.f32.mrf.mxu1 }
 0x252   :  { %v1223_v27 = vadd.f32 %v2392_v19, %v1098_v24  ;;  %v1090_v28 = vadd.f32 %v1089_v25, %v784_v52  ;;  %v1252_v35 = vmax.f32 %v1220_v26, 0.0 }
 0x253   :  { %v1902_v29 = vpop.f32.mrf.mxu1 }
 0x254   :  { %v1255_v31 = vmax.f32 %v1223_v27, 0.0  ;;  %v1221_v32 = vadd.f32 %v2392_v19, %v1090_v28  ;;  %v1111_v33 = vadd.f32 %v1902_v29, %v1854_v53 }
 0x255   :  { %v1102_v34 = vpop.f32.mrf.mxu1 }
 0x256   :  { %v1585_v36 = vpack.c.bf16 %v1255_v31, %v1254_v30  ;;  %v1253_v37 = vmax.f32 %v1221_v32, 0.0  ;;  %v1103_v38 = vadd.f32 %v1102_v34, %v797_v54  ;;  %v1226_v41 = vadd.f32 %v2392_v19, %v1111_v33 }
 0x257   :  { %v1903_v39 = vpop.f32.mrf.mxu1 }
 0x258   :  { %1657 = vst [vmem:[#allocation7 + $0x8] sm:$0xff] %v1585_v36   ;;  %v1580_v40 = vpack.c.bf16 %v1253_v37, %v1252_v35  ;;  %v1114_v42 = vadd.f32 %v1903_v39, %v1855_v55  ;;  %v1224_v44 = vadd.f32 %v2392_v19, %v1103_v38  ;;  %v1258_v48 = vmax.f32 %v1226_v41, 0.0 }
 0x259   :  { %v1105_v43 = vpop.f32.mrf.mxu1 }
 0x25a   :  { %1581 = vst [vmem:[#allocation7] sm:$0xff] %v1580_v40   ;;  %v1227_v45 = vadd.f32 %v2392_v19, %v1114_v42  ;;  %v1106_v46 = vadd.f32 %v1105_v43, %v800_v56  ;;  %v1256_v53 = vmax.f32 %v1224_v44, 0.0 }
 0x25b   :  { %v1906_v47 = vpop.f32.mrf.mxu1 }
 0x25c   :  { %v1259_v49 = vmax.f32 %v1227_v45, 0.0  ;;  %v1225_v50 = vadd.f32 %v2392_v19, %v1106_v46  ;;  %v1127_v51 = vadd.f32 %v1906_v47, %v1858_v57 }
 0x25d   :  { %v1118_v52 = vpop.f32.mrf.mxu1 }
 0x25e   :  { %v1595_v54 = vpack.c.bf16 %v1259_v49, %v1258_v48  ;;  %v1257_v17 = vmax.f32 %v1225_v50, 0.0  ;;  %v1119_v18 = vadd.f32 %v1118_v52, %v2343_v58  ;;  %v1230_v21 = vadd.f32 %v2392_v19, %v1127_v51 }
 0x25f   :  { %v1907_v55 = vpop.f32.mrf.mxu1 }
 0x260   :  { %1659 = vst [vmem:[#allocation7 + $0x18] sm:$0xff] %v1595_v54   ;;  %v1590_v20 = vpack.c.bf16 %v1257_v17, %v1256_v53  ;;  %v1130_v22 = vadd.f32 %v1907_v55, %v2345_v59  ;;  %v1228_v23 = vadd.f32 %v2392_v19, %v1119_v18  ;;  %v1262_v26 = vmax.f32 %v1230_v21, 0.0 }
 0x261   :  { %v1121_v56 = vpop.f32.mrf.mxu1 }
 0x262   :  { %1658 = vst [vmem:[#allocation7 + $0x10] sm:$0xff] %v1590_v20   ;;  %v1231_v24 = vadd.f32 %v2392_v19, %v1130_v22  ;;  %v1122_v57 = vadd.f32 %v1121_v56, %v2347_v60  ;;  %v1260_v30 = vmax.f32 %v1228_v23, 0.0 }
 0x263   :  { %v1910_v25 = vpop.f32.mrf.mxu1 }
 0x264   :  { %v1263_v27 = vmax.f32 %v1231_v24, 0.0  ;;  %v1229_v58 = vadd.f32 %v2392_v19, %v1122_v57  ;;  %v1143_v28 = vadd.f32 %v1910_v25, %v2349_v61 }
 0x265   :  { %v1134_v29 = vpop.f32.mrf.mxu1 }
 0x266   :  { %v1605_v31 = vpack.c.bf16 %v1263_v27, %v1262_v26  ;;  %v1261_v32 = vmax.f32 %v1229_v58, 0.0  ;;  %v1135_v59 = vadd.f32 %v1134_v29, %v2351_v62  ;;  %v1234_v35 = vadd.f32 %v2392_v19, %v1143_v28 }
 0x267   :  { %v1911_v33 = vpop.f32.mrf.mxu1 }
 0x268   :  { %1661 = vst [vmem:[#allocation7 + $0x28] sm:$0xff] %v1605_v31   ;;  %v1600_v34 = vpack.c.bf16 %v1261_v32, %v1260_v30  ;;  %v1146_v60 = vadd.f32 %v1911_v33, %v2353_v63  ;;  %v1232_v37 = vadd.f32 %v2392_v19, %v1135_v59  ;;  %v1266_v40 = vmax.f32 %v1234_v35, 0.0 }
 0x269   :  { %v1137_v36 = vpop.f32.mrf.mxu1 }
 0x26a   :  { %1660 = vst [vmem:[#allocation7 + $0x20] sm:$0xff] %v1600_v34   ;;  %v1235_v38 = vadd.f32 %v2392_v19, %v1146_v60  ;;  %v1138_v61 = vadd.f32 %v1137_v36, %v2355_v0  ;;  %v1264_v44 = vmax.f32 %v1232_v37, 0.0 }
 0x26b   :  { %v1914_v39 = vpop.f32.mrf.mxu1 }
 0x26c   :  { %v1267_v41 = vmax.f32 %v1235_v38, 0.0  ;;  %v1233_v62 = vadd.f32 %v2392_v19, %v1138_v61  ;;  %v1159_v42 = vadd.f32 %v1914_v39, %v2357_v1 }
 0x26d   :  { %v1150_v43 = vpop.f32.mrf.mxu1 }
 0x26e   :  { %v1615_v45 = vpack.c.bf16 %v1267_v41, %v1266_v40  ;;  %v1265_v46 = vmax.f32 %v1233_v62, 0.0  ;;  %v1151_v63 = vadd.f32 %v1150_v43, %v2359_v2  ;;  %v1238_v49 = vadd.f32 %v2392_v19, %v1159_v42 }
 0x26f   :  { %v1915_v47 = vpop.f32.mrf.mxu1 }
 0x270   :  { %1663 = vst [vmem:[#allocation7 + $0x38] sm:$0xff] %v1615_v45   ;;  %v1610_v48 = vpack.c.bf16 %v1265_v46, %v1264_v44  ;;  %v1162_v0 = vadd.f32 %v1915_v47, %v2361_v3  ;;  %v1236_v51 = vadd.f32 %v2392_v19, %v1151_v63  ;;  %v1270_v54 = vmax.f32 %v1238_v49, 0.0 }
 0x271   :  { %v1153_v50 = vpop.f32.mrf.mxu1 }
 0x272   :  { %1662 = vst [vmem:[#allocation7 + $0x30] sm:$0xff] %v1610_v48   ;;  %v1239_v52 = vadd.f32 %v2392_v19, %v1162_v0  ;;  %v1154_v1 = vadd.f32 %v1153_v50, %v2363_v4  ;;  %v1268_v20 = vmax.f32 %v1236_v51, 0.0 }
 0x273   :  { %v1918_v53 = vpop.f32.mrf.mxu1 }
 0x274   :  { %v1271_v17 = vmax.f32 %v1239_v52, 0.0  ;;  %v1237_v2 = vadd.f32 %v2392_v19, %v1154_v1  ;;  %v1175_v18 = vadd.f32 %v1918_v53, %v2365_v5 }
 0x275   :  { %v1166_v55 = vpop.f32.mrf.mxu1 }
 0x276   :  { %v1625_v21 = vpack.c.bf16 %v1271_v17, %v1270_v54  ;;  %v1269_v22 = vmax.f32 %v1237_v2, 0.0  ;;  %v1167_v3 = vadd.f32 %v1166_v55, %v2367_v6  ;;  %v1242_v24 = vadd.f32 %v2392_v19, %v1175_v18 }
 0x277   :  { %v1919_v56 = vpop.f32.mrf.mxu1 }
 0x278   :  { %1665 = vst [vmem:[#allocation7 + $0x48] sm:$0xff] %v1625_v21   ;;  %v1620_v23 = vpack.c.bf16 %v1269_v22, %v1268_v20  ;;  %v1178_v4 = vadd.f32 %v1919_v56, %v2369_v7  ;;  %v1240_v25 = vadd.f32 %v2392_v19, %v1167_v3  ;;  %v1274_v58 = vmax.f32 %v1242_v24, 0.0 }
 0x279   :  { %v1169_v57 = vpop.f32.mrf.mxu1 }
 0x27a   :  { %1664 = vst [vmem:[#allocation7 + $0x40] sm:$0xff] %v1620_v23   ;;  %v1243_v26 = vadd.f32 %v2392_v19, %v1178_v4  ;;  %v1170_v5 = vadd.f32 %v1169_v57, %v2371_v8  ;;  %v1272_v31 = vmax.f32 %v1240_v25, 0.0 }
 0x27b   :  { %v1922_v27 = vpop.f32.mrf.mxu1 }
 0x27c   :  { %v1275_v28 = vmax.f32 %v1243_v26, 0.0  ;;  %v1241_v6 = vadd.f32 %v2392_v19, %v1170_v5  ;;  %v1191_v29 = vadd.f32 %v1922_v27, %v2373_v9 }
 0x27d   :  { %v1182_v30 = vpop.f32.mrf.mxu1 }
 0x27e   :  { %v1635_v32 = vpack.c.bf16 %v1275_v28, %v1274_v58  ;;  %v1273_v59 = vmax.f32 %v1241_v6, 0.0  ;;  %v1183_v7 = vadd.f32 %v1182_v30, %v2375_v10  ;;  %v1246_v35 = vadd.f32 %v2392_v19, %v1191_v29 }
 0x27f   :  { %v1923_v33 = vpop.f32.mrf.mxu1 }
 0x280   :  { %1667 = vst [vmem:[#allocation7 + $0x58] sm:$0xff] %v1635_v32   ;;  %v1630_v34 = vpack.c.bf16 %v1273_v59, %v1272_v31  ;;  %v1194_v8 = vadd.f32 %v1923_v33, %v2377_v11  ;;  %v1244_v36 = vadd.f32 %v2392_v19, %v1183_v7  ;;  %v1278_v61 = vmax.f32 %v1246_v35, 0.0 }
 0x281   :  { %v1185_v60 = vpop.f32.mrf.mxu1 }
 0x282   :  { %1666 = vst [vmem:[#allocation7 + $0x50] sm:$0xff] %v1630_v34   ;;  %v1247_v37 = vadd.f32 %v2392_v19, %v1194_v8  ;;  %v1186_v9 = vadd.f32 %v1185_v60, %v2379_v12  ;;  %v1276_v62 = vmax.f32 %v1244_v36, 0.0 }
 0x283   :  { %v1926_v38 = vpop.f32.mrf.mxu1 }
 0x284   :  { %v1279_v39 = vmax.f32 %v1247_v37, 0.0  ;;  %v1245_v10 = vadd.f32 %v2392_v19, %v1186_v9  ;;  %v1207_v40 = vadd.f32 %v1926_v38, %v2381_v13 }
 0x285   :  { %v1198_v41 = vpop.f32.mrf.mxu1 }
 0x286   :  { %v1645_v42 = vpack.c.bf16 %v1279_v39, %v1278_v61  ;;  %v1277_v43 = vmax.f32 %v1245_v10, 0.0  ;;  %v1199_v11 = vadd.f32 %v1198_v41, %v2383_v14  ;;  %v1250_v46 = vadd.f32 %v2392_v19, %v1207_v40 }
 0x287   :  { %v1927_v44 = vpop.f32.mrf.mxu1 }
 0x288   :  { %1669 = vst [vmem:[#allocation7 + $0x68] sm:$0xff] %v1645_v42   ;;  %v1640_v45 = vpack.c.bf16 %v1277_v43, %v1276_v62  ;;  %v1210_v12 = vadd.f32 %v1927_v44, %v2385_v15  ;;  %v1248_v47 = vadd.f32 %v2392_v19, %v1199_v11  ;;  %v1282_v49 = vmax.f32 %v1250_v46, 0.0 }
 0x289   :  { %v1201_v63 = vpop.f32.mrf.mxu1 }
 0x28a   :  { %1668 = vst [vmem:[#allocation7 + $0x60] sm:$0xff] %v1640_v45   ;;  %v1251_v48 = vadd.f32 %v2392_v19, %v1210_v12  ;;  %v1202_v13 = vadd.f32 %v1201_v63, %v2387_v16  ;;  %v1280_v14 = vmax.f32 %v1248_v47, 0.0 }
 0x28c   :  { %v1283_v0 = vmax.f32 %v1251_v48, 0.0  ;;  %v1249_v50 = vadd.f32 %v2392_v19, %v1202_v13 }
 0x28e   :  { %v1655_v51 = vpack.c.bf16 %v1283_v0, %v1282_v49  ;;  %v1281_v52 = vmax.f32 %v1249_v50, 0.0 }
 0x290   :  { %1671 = vst [vmem:[#allocation7 + $0x78] sm:$0xff] %v1655_v51   ;;  %v1650_v1 = vpack.c.bf16 %v1281_v52, %v1280_v14 }
 0x292   :  { %1670 = vst [vmem:[#allocation7 + $0x70] sm:$0xff] %v1650_v1  }
 0x293   :  { %2035 = shalt.err (!%p2032_p0)
}
 0x294   :  { %1455 = dma.vmem_to_hbm [thread:$0]  %s1450_s20, 2048, %s2461_s6, [#allocation4], %s2051_s24, %s2051_s24, %s2052_s25  }
 0x295   :  { %2048 = dma.done.wait [#allocation4], 2048  }
 0x296   :  { %2049 = vsyncadd [#allocation4], 4294965248 }
 0x297   :  { %1459 = vsyncpa [#allocation3], 1 }
 0x298   :  { %1460 = vsyncpa [#allocation6], 1 }
 0x299   :  { %1461 = vsyncpa [#allocation4], 1 }

</bundles_post_ra>
